<compile_context>
chip_gen: v7x
topology: tpu7x:2x2x1
jax: 0.10.0
libtpu: 0.0.40
codegen_flags: <defaults>
</compile_context>

<pallas_src>
import functools

import jax
import jax.numpy as jnp
import numpy as np
from jax import lax
from jax.experimental import pallas as pl
from jax.experimental.pallas import tpu as pltpu


def _round_up(v: int, m: int) -> int:
    return (v + m - 1) // m * m


# ----------------------------------------------------------------------------
# Pallas kernel: one token tile per grid step.
# ----------------------------------------------------------------------------
def _dynamics_kernel(x_ref, p_ref, hc_ref, part_ref, *, steps, n_valid, tile_n, d):
    w = 2 * d
    # parameter-slab row offsets (all multiples of 8; see _pack_param_slab)
    r_w1 = 0
    r_b1 = d
    r_w2 = d + 8
    r_b2 = d + 8 + w
    r_ws = d + 16 + w
    r_bs = d + 16 + 2 * w

    x = x_ref[...]                                   # (T, d)
    w1 = p_ref[r_w1:r_w1 + d, :]                     # (d, w)  [hm_w1 | lf_w1 | 0]
    b1 = p_ref[r_b1:r_b1 + 1, :]                     # (1, w)
    w2 = p_ref[r_w2:r_w2 + w, :]                     # (w, w)  block-diag 2nd layers
    b2 = p_ref[r_b2:r_b2 + 1, :]                     # (1, w)
    ws = p_ref[r_ws:r_ws + w, :]                     # (w, w)  [fl_w*csum ; 0.1*I]
    bs = p_ref[r_bs:r_bs + 1, :]                     # (1, w)  [fl_b*csum | 0]

    # fused first layers (height_map.0 | l_function.0) -> tanh -> fused second
    # layers; c = [height_coords | l_values]
    h1 = jnp.tanh(jnp.dot(x, w1, preferred_element_type=jnp.float32) + b1)
    c = jnp.dot(h1, w2, preferred_element_type=jnp.float32) + b2    # (T, w)

    # hoist the bias broadcast out of the step loop
    bs_full = jnp.broadcast_to(bs, (tile_n, w))

    def body(_, carry):
        c_cur, _ = carry
        # flow_field = hc @ (fl_w*csum) + fl_b*csum + 0.1*lv, in one matmul
        fc = jnp.dot(c_cur, ws, preferred_element_type=jnp.float32) + bs_full
        return c_cur + fc, fc

    if steps > 0:
        c, fc = lax.fori_loop(0, steps, body, (c, jnp.zeros_like(c)),
                              unroll=True if steps <= 8 else False)
    else:
        fc = jnp.zeros_like(c)

    hc = c[:, 0:d]          # height coords
    lv = c[:, d:w]          # l_values (unchanged by the loop)
    ff = fc[:, 0:d]         # last flow_field

    hc_ref[...] = hc

    # masked partial sums of squares (rows beyond n_valid are wrapper padding)
    row = (jax.lax.broadcasted_iota(jnp.int32, (tile_n, 1), 0)
           + pl.program_id(0) * tile_n)
    m = (row < n_valid).astype(jnp.float32)
    hsum = jnp.sum(hc * hc * m, keepdims=True)       # (1, 1)
    fsum = jnp.sum(ff * ff * m, keepdims=True)
    lsum = jnp.sum(lv * lv * m, keepdims=True)

    subl = jax.lax.broadcasted_iota(jnp.int32, (8, 128), 0)
    lane = jax.lax.broadcasted_iota(jnp.int32, (8, 128), 1)
    part = (jnp.where((subl == 0) & (lane == 0), hsum, 0.0)
            + jnp.where((subl == 0) & (lane == 1), fsum, 0.0)
            + jnp.where((subl == 0) & (lane == 2), lsum, 0.0))
    part_ref[...] = part                              # (8, 128) lane-dense tile


# ----------------------------------------------------------------------------
# Parameter packing: one f32 slab, loop invariants folded in.
# ----------------------------------------------------------------------------
def _pack_param_slab(p, d, h2):
    w = 2 * d
    csum = jnp.sum(p["coupling"].astype(jnp.float32), axis=0)        # (d,)

    w1 = jnp.zeros((d, w), jnp.float32)
    w1 = w1.at[:, :h2].set(p["hm_w1"]).at[:, h2:2 * h2].set(p["lf_w1"])
    b1 = jnp.zeros((8, w), jnp.float32)
    b1 = b1.at[0:1, :h2].set(p["hm_b1"]).at[0:1, h2:2 * h2].set(p["lf_b1"])

    w2 = jnp.zeros((w, w), jnp.float32)
    w2 = w2.at[:h2, :d].set(p["hm_w2"]).at[h2:2 * h2, d:].set(p["lf_w2"])
    b2 = jnp.zeros((8, w), jnp.float32)
    b2 = b2.at[0:1, :d].set(p["hm_b2"]).at[0:1, d:].set(p["lf_b2"])

    ws = jnp.zeros((w, w), jnp.float32)
    ws = ws.at[:d, :d].set(p["fl_w"] * csum[None, :])                # flow ⊙ coupling
    ws = ws.at[d:, :d].set(0.1 * jnp.eye(d, dtype=jnp.float32))      # +0.1*l_values
    bs = jnp.zeros((8, w), jnp.float32)
    bs = bs.at[0:1, :d].set(p["fl_b"] * csum[None, :])

    return jnp.concatenate([w1, b1, w2, b2, ws, bs], axis=0)         # (d+2w+24, w)


# ----------------------------------------------------------------------------
# Wrapper
# ----------------------------------------------------------------------------
def arithmetic_dynamics_forward(x, params, steps: int = 1, tile_n: int = 512):
    """x: (B, S, H) f32 -> (height_coords (B, S, HD), metrics dict)."""
    B, S, H = x.shape
    h2 = params["hm_w1"].shape[1]
    d = params["hm_w2"].shape[1]
    assert H == d == params["lf_w2"].shape[1], (
        "forward() is only shape-consistent when hidden==height_dim==motive_rank")

    n = B * S
    tile = max(8, min(tile_n, _round_up(n, 8)))
    n_pad = _round_up(n, tile)
    num_tiles = n_pad // tile

    x2 = x.reshape(n, H).astype(jnp.float32)
    if n_pad != n:
        x2 = jnp.pad(x2, ((0, n_pad - n), (0, 0)))

    slab = _pack_param_slab(params, d, h2)
    slab_rows, slab_cols = slab.shape

    kernel = functools.partial(
        _dynamics_kernel, steps=steps, n_valid=n, tile_n=tile, d=d)

    hc_pad, partials = pl.pallas_call(
        kernel,
        grid=(num_tiles,),
        in_specs=[
            pl.BlockSpec((tile, H), lambda i: (i, 0)),              # pipelined tokens
            pl.BlockSpec((slab_rows, slab_cols), lambda i: (0, 0)),  # resident params
        ],
        out_specs=(
            pl.BlockSpec((tile, d), lambda i: (i, 0)),
            pl.BlockSpec((8, 128), lambda i: (i, 0)),
        ),
        out_shape=(
            jax.ShapeDtypeStruct((n_pad, d), jnp.float32),
            jax.ShapeDtypeStruct((num_tiles * 8, 128), jnp.float32),
        ),
        compiler_params=pltpu.CompilerParams(
            dimension_semantics=("parallel",),       # shards tiles across TCs (v7x)
            vmem_limit_bytes=32 * 1024 * 1024,       # safe on v5e/v6e/v7x
        ),
    )(x2, slab)

    height_coords = hc_pad[:n].reshape(B, S, d)
    sums = jnp.sum(partials, axis=0)                  # (128,)
    metrics = {
        "height_norm": jnp.sqrt(sums[0]),
        "flow_norm": jnp.sqrt(sums[1]),
        "l_values_norm": jnp.sqrt(sums[2]),
        "coupling_norm": jnp.sqrt(
            jnp.sum(params["coupling"].astype(jnp.float32) ** 2)),
    }
    return height_coords, metrics


# ----------------------------------------------------------------------------
# Pure-JAX reference (mirrors the PyTorch forward) for validation.
# ----------------------------------------------------------------------------
def reference_forward(x, p, steps: int = 1):
    B, S, H = x.shape
    xf = x.reshape(-1, H)
    hc = jnp.tanh(xf @ p["hm_w1"] + p["hm_b1"]) @ p["hm_w2"] + p["hm_b2"]
    lv = jnp.tanh(xf @ p["lf_w1"] + p["lf_b1"]) @ p["lf_w2"] + p["lf_b2"]
    csum = p["coupling"].sum(axis=0)
    flow_field = jnp.zeros_like(hc)
    for _ in range(steps):
        base_flow = hc @ p["fl_w"] + p["fl_b"]
        flow_field = csum * base_flow + 0.1 * lv
        hc = hc + flow_field
    metrics = {
        "height_norm": jnp.linalg.norm(hc),
        "flow_norm": jnp.linalg.norm(flow_field),
        "l_values_norm": jnp.linalg.norm(lv),
        "coupling_norm": jnp.linalg.norm(p["coupling"]),
    }
    return hc.reshape(B, S, -1), metrics


# ----------------------------------------------------------------------------
# Deterministic parameter construction (shapes from the module __init__).
# ----------------------------------------------------------------------------
def make_params(key, hidden_dim, height_dim, motive_rank, num_primes):
    H, H2, HD, MR, P = hidden_dim, hidden_dim // 2, height_dim, motive_rank, num_primes
    ks = jax.random.split(key, 12)
    u = lambda k, shape, fan_in: jax.random.uniform(
        k, shape, jnp.float32, -1.0 / np.sqrt(fan_in), 1.0 / np.sqrt(fan_in))
    return {
        # height_map: Linear(H, H//2) -> Tanh -> Linear(H//2, HD)
        "hm_w1": u(ks[0], (H, H2), H),
        "hm_b1": u(ks[1], (1, H2), H),
        "hm_w2": u(ks[2], (H2, HD), H2),
        "hm_b2": u(ks[3], (1, HD), H2),
        # flow: Linear(H, H) (applied to height coords; HD == H)
        "fl_w": u(ks[4], (HD, HD), HD),
        "fl_b": u(ks[5], (1, HD), HD),
        # l_function: Linear(H, H//2) -> Tanh -> Linear(H//2, MR)
        "lf_w1": u(ks[6], (H, H2), H),
        "lf_b1": u(ks[7], (1, H2), H),
        "lf_w2": u(ks[8], (H2, MR), H2),
        "lf_b2": u(ks[9], (1, MR), H2),
        # coupling: randn(P, HD) / sqrt(P * HD)
        "coupling": jax.random.normal(ks[10], (P, HD), jnp.float32)
        / np.sqrt(P * HD),
    }


def _check(x, params, steps, tile_n):
    hc, metrics = arithmetic_dynamics_forward(x, params, steps=steps, tile_n=tile_n)
    hc = jax.block_until_ready(hc)
    metrics = {k: jax.block_until_ready(v) for k, v in metrics.items()}
    hc_ref, metrics_ref = reference_forward(x, params, steps=steps)
    np.testing.assert_allclose(np.asarray(hc), np.asarray(hc_ref),
                               rtol=1e-4, atol=1e-5)
    for k in metrics:
        np.testing.assert_allclose(np.asarray(metrics[k]),
                                   np.asarray(metrics_ref[k]),
                                   rtol=1e-4, atol=1e-5)


if __name__ == "__main__":
    # forward() shape-consistency requires hidden_dim == height_dim == motive_rank
    HIDDEN = HEIGHT = MOTIVE = 32
    PRIMES = 8

    key = jax.random.PRNGKey(0)
    kx, kp, kx2 = jax.random.split(key, 3)
    params = make_params(kp, HIDDEN, HEIGHT, MOTIVE, PRIMES)

    # primary small example: batch=2, seq=8, hidden=32, steps=1
    x = jax.random.normal(kx, (2, 8, HIDDEN), jnp.float32)
    _check(x, params, steps=1, tile_n=512)

    # multi-tile grid + fori_loop over more steps (tiny tile forces grid=2)
    _check(x, params, steps=3, tile_n=8)

    # token count not a multiple of the tile -> exercises padding / norm mask
    x_odd = jax.random.normal(kx2, (3, 5, HIDDEN), jnp.float32)
    _check(x_odd, params, steps=2, tile_n=512)

    print("KERNEL_OK")
</pallas_src>

<mosaic_0001>
module attributes {stable_mosaic.version = 11 : i64} {
  func.func @_dynamics_kernel(%arg0: i32, %arg1: memref<16x32xf32, #tpu.memory_space<vmem>>, %arg2: memref<184x64xf32, #tpu.memory_space<vmem>>, %arg3: memref<16x32xf32, #tpu.memory_space<vmem>>, %arg4: memref<8x128xf32, #tpu.memory_space<vmem>>) attributes {dimension_semantics = [#tpu.dimension_semantics<parallel>], iteration_bounds = array<i64: 1>, scalar_prefetch = 0 : i64, scratch_operands = 0 : i64, tpu.core_type = #tpu.core_type<tc>, window_params = [{transform_indices = @transform_0, window_bounds = array<i64: 16, 32>}, {pipeline_mode = #tpu.pipeline_mode<synchronous>, transform_indices = @transform_1, window_bounds = array<i64: 184, 64>}, {transform_indices = @transform_2, window_bounds = array<i64: 16, 32>}, {transform_indices = @transform_3, window_bounds = array<i64: 8, 128>}]} {
    %c0 = arith.constant 0 : index
    %c0_0 = arith.constant 0 : index
    %0 = vector.load %arg1[%c0, %c0_0] : memref<16x32xf32, #tpu.memory_space<vmem>>, vector<16x32xf32>
    %c0_1 = arith.constant 0 : index
    %c0_2 = arith.constant 0 : index
    %1 = vector.load %arg2[%c0_1, %c0_2] : memref<184x64xf32, #tpu.memory_space<vmem>>, vector<32x64xf32>
    %c32 = arith.constant 32 : index
    %c0_3 = arith.constant 0 : index
    %2 = vector.load %arg2[%c32, %c0_3] : memref<184x64xf32, #tpu.memory_space<vmem>>, vector<1x64xf32>
    %c40 = arith.constant 40 : index
    %c0_4 = arith.constant 0 : index
    %3 = vector.load %arg2[%c40, %c0_4] : memref<184x64xf32, #tpu.memory_space<vmem>>, vector<64x64xf32>
    %c104 = arith.constant 104 : index
    %c0_5 = arith.constant 0 : index
    %4 = vector.load %arg2[%c104, %c0_5] : memref<184x64xf32, #tpu.memory_space<vmem>>, vector<1x64xf32>
    %c112 = arith.constant 112 : index
    %c0_6 = arith.constant 0 : index
    %5 = vector.load %arg2[%c112, %c0_6] : memref<184x64xf32, #tpu.memory_space<vmem>>, vector<64x64xf32>
    %c176 = arith.constant 176 : index
    %c0_7 = arith.constant 0 : index
    %6 = vector.load %arg2[%c176, %c0_7] : memref<184x64xf32, #tpu.memory_space<vmem>>, vector<1x64xf32>
    %cst = arith.constant dense<0.000000e+00> : vector<16x64xf32>
    %7 = tpu.matmul %0, %1, %cst {dimension_numbers = #tpu.dot_dimension_numbers<[1], [0], [0], [1], [0, 0, 1, 1], [], []>} : vector<16x32xf32>, vector<32x64xf32>, vector<16x64xf32> -> vector<16x64xf32>
    %8 = vector.broadcast %2 : vector<1x64xf32> to vector<16x64xf32>
    %9 = arith.addf %7, %8 : vector<16x64xf32>
    %10 = math.tanh %9 : vector<16x64xf32>
    %cst_8 = arith.constant dense<0.000000e+00> : vector<16x64xf32>
    %11 = tpu.matmul %10, %3, %cst_8 {dimension_numbers = #tpu.dot_dimension_numbers<[1], [0], [0], [1], [0, 0, 1, 1], [], []>} : vector<16x64xf32>, vector<64x64xf32>, vector<16x64xf32> -> vector<16x64xf32>
    %12 = vector.broadcast %4 : vector<1x64xf32> to vector<16x64xf32>
    %13 = arith.addf %11, %12 : vector<16x64xf32>
    %14 = vector.shape_cast %6 : vector<1x64xf32> to vector<1x64xf32>
    %15 = vector.broadcast %14 : vector<1x64xf32> to vector<16x64xf32>
    %cst_9 = arith.constant 0.000000e+00 : f32
    %16 = vector.broadcast %cst_9 : f32 to vector<16x64xf32>
    %c0_i32 = arith.constant 0 : i32
    %cst_10 = arith.constant dense<0.000000e+00> : vector<16x64xf32>
    %17 = tpu.matmul %13, %5, %cst_10 {dimension_numbers = #tpu.dot_dimension_numbers<[1], [0], [0], [1], [0, 0, 1, 1], [], []>} : vector<16x64xf32>, vector<64x64xf32>, vector<16x64xf32> -> vector<16x64xf32>
    %18 = arith.addf %17, %15 : vector<16x64xf32>
    %19 = arith.addf %13, %18 : vector<16x64xf32>
    %20 = vector.extract_strided_slice %19 {offsets = [0, 0], sizes = [16, 32], strides = [1, 1]} : vector<16x64xf32> to vector<16x32xf32>
    %21 = vector.extract_strided_slice %19 {offsets = [0, 32], sizes = [16, 32], strides = [1, 1]} : vector<16x64xf32> to vector<16x32xf32>
    %22 = vector.extract_strided_slice %18 {offsets = [0, 0], sizes = [16, 32], strides = [1, 1]} : vector<16x64xf32> to vector<16x32xf32>
    %c0_11 = arith.constant 0 : index
    %c0_12 = arith.constant 0 : index
    %23 = vector.load %arg3[%c0_11, %c0_12] : memref<16x32xf32, #tpu.memory_space<vmem>>, vector<16x32xf32>
    tpu.vector_store %arg3[%c0_11, %c0_12], %20 {strides = array<i32>} : memref<16x32xf32, #tpu.memory_space<vmem>>, vector<16x32xf32>,
    %24 = tpu.iota {dimensions = array<i32: 0>} : vector<16x1xi32>
    %c16_i32 = arith.constant 16 : i32
    %25 = arith.muli %arg0, %c16_i32 : i32
    %26 = vector.broadcast %25 : i32 to vector<16x1xi32>
    %27 = arith.addi %24, %26 : vector<16x1xi32>
    %c16_i32_13 = arith.constant 16 : i32
    %28 = vector.broadcast %c16_i32_13 : i32 to vector<16x1xi32>
    %29 = arith.cmpi slt, %27, %28 : vector<16x1xi32>
    %30 = arith.extui %29 : vector<16x1xi1> to vector<16x1xi32>
    %31 = arith.sitofp %30 : vector<16x1xi32> to vector<16x1xf32>
    %32 = arith.mulf %20, %20 : vector<16x32xf32>
    %33 = vector.broadcast %31 : vector<16x1xf32> to vector<16x32xf32>
    %34 = arith.mulf %32, %33 : vector<16x32xf32>
    %35 = vector.shape_cast %34 : vector<16x32xf32> to vector<1x16x32xf32>
    %cst_14 = arith.constant dense<0.000000e+00> : vector<1xf32>
    %36 = vector.multi_reduction <add>, %35, %cst_14 [1, 2] : vector<1x16x32xf32> to vector<1xf32>
    %37 = vector.shape_cast %36 : vector<1xf32> to vector<1x1x1xf32>
    %38 = vector.extract %37[0, 0, 0] : f32 from vector<1x1x1xf32>
    %39 = vector.broadcast %38 : f32 to vector<1x1xf32>
    %40 = arith.mulf %22, %22 : vector<16x32xf32>
    %41 = vector.broadcast %31 : vector<16x1xf32> to vector<16x32xf32>
    %42 = arith.mulf %40, %41 : vector<16x32xf32>
    %43 = vector.shape_cast %42 : vector<16x32xf32> to vector<1x16x32xf32>
    %cst_15 = arith.constant dense<0.000000e+00> : vector<1xf32>
    %44 = vector.multi_reduction <add>, %43, %cst_15 [1, 2] : vector<1x16x32xf32> to vector<1xf32>
    %45 = vector.shape_cast %44 : vector<1xf32> to vector<1x1x1xf32>
    %46 = vector.extract %45[0, 0, 0] : f32 from vector<1x1x1xf32>
    %47 = vector.broadcast %46 : f32 to vector<1x1xf32>
    %48 = arith.mulf %21, %21 : vector<16x32xf32>
    %49 = vector.broadcast %31 : vector<16x1xf32> to vector<16x32xf32>
    %50 = arith.mulf %48, %49 : vector<16x32xf32>
    %51 = vector.shape_cast %50 : vector<16x32xf32> to vector<1x16x32xf32>
    %cst_16 = arith.constant dense<0.000000e+00> : vector<1xf32>
    %52 = vector.multi_reduction <add>, %51, %cst_16 [1, 2] : vector<1x16x32xf32> to vector<1xf32>
    %53 = vector.shape_cast %52 : vector<1xf32> to vector<1x1x1xf32>
    %54 = vector.extract %53[0, 0, 0] : f32 from vector<1x1x1xf32>
    %55 = vector.broadcast %54 : f32 to vector<1x1xf32>
    %56 = tpu.iota {dimensions = array<i32: 0>} : vector<8x128xi32>
    %57 = tpu.iota {dimensions = array<i32: 1>} : vector<8x128xi32>
    %c0_i32_17 = arith.constant 0 : i32
    %58 = vector.broadcast %c0_i32_17 : i32 to vector<8x128xi32>
    %59 = arith.cmpi eq, %56, %58 : vector<8x128xi32>
    %c0_i32_18 = arith.constant 0 : i32
    %60 = vector.broadcast %c0_i32_18 : i32 to vector<8x128xi32>
    %61 = arith.cmpi eq, %57, %60 : vector<8x128xi32>
    %62 = arith.andi %59, %61 : vector<8x128xi1>
    %cst_19 = arith.constant 0.000000e+00 : f32
    %63 = vector.shape_cast %39 : vector<1x1xf32> to vector<1x1xf32>
    %64 = vector.broadcast %63 : vector<1x1xf32> to vector<8x128xf32>
    %65 = vector.broadcast %cst_19 : f32 to vector<8x128xf32>
    %66 = arith.select %62, %64, %65 : vector<8x128xi1>, vector<8x128xf32>
    %c0_i32_20 = arith.constant 0 : i32
    %67 = vector.broadcast %c0_i32_20 : i32 to vector<8x128xi32>
    %68 = arith.cmpi eq, %56, %67 : vector<8x128xi32>
    %c1_i32 = arith.constant 1 : i32
    %69 = vector.broadcast %c1_i32 : i32 to vector<8x128xi32>
    %70 = arith.cmpi eq, %57, %69 : vector<8x128xi32>
    %71 = arith.andi %68, %70 : vector<8x128xi1>
    %cst_21 = arith.constant 0.000000e+00 : f32
    %72 = vector.shape_cast %47 : vector<1x1xf32> to vector<1x1xf32>
    %73 = vector.broadcast %72 : vector<1x1xf32> to vector<8x128xf32>
    %74 = vector.broadcast %cst_21 : f32 to vector<8x128xf32>
    %75 = arith.select %71, %73, %74 : vector<8x128xi1>, vector<8x128xf32>
    %76 = arith.addf %66, %75 : vector<8x128xf32>
    %c0_i32_22 = arith.constant 0 : i32
    %77 = vector.broadcast %c0_i32_22 : i32 to vector<8x128xi32>
    %78 = arith.cmpi eq, %56, %77 : vector<8x128xi32>
    %c2_i32 = arith.constant 2 : i32
    %79 = vector.broadcast %c2_i32 : i32 to vector<8x128xi32>
    %80 = arith.cmpi eq, %57, %79 : vector<8x128xi32>
    %81 = arith.andi %78, %80 : vector<8x128xi1>
    %cst_23 = arith.constant 0.000000e+00 : f32
    %82 = vector.shape_cast %55 : vector<1x1xf32> to vector<1x1xf32>
    %83 = vector.broadcast %82 : vector<1x1xf32> to vector<8x128xf32>
    %84 = vector.broadcast %cst_23 : f32 to vector<8x128xf32>
    %85 = arith.select %81, %83, %84 : vector<8x128xi1>, vector<8x128xf32>
    %86 = arith.addf %76, %85 : vector<8x128xf32>
    %c0_24 = arith.constant 0 : index
    %c0_25 = arith.constant 0 : index
    %87 = vector.load %arg4[%c0_24, %c0_25] : memref<8x128xf32, #tpu.memory_space<vmem>>, vector<8x128xf32>
    tpu.vector_store %arg4[%c0_24, %c0_25], %86 {strides = array<i32>} : memref<8x128xf32, #tpu.memory_space<vmem>>, vector<8x128xf32>,
    return
  }
  func.func @transform_0(%arg0: i32) -> (i32, i32) {
    %c0_i32 = arith.constant 0 : i32
    %c0_i32_0 = arith.constant 0 : i32
    return %arg0, %c0_i32 : i32, i32
  }
  func.func @transform_1(%arg0: i32) -> (i32, i32) {
    %c0_i32 = arith.constant 0 : i32
    %c0_i32_0 = arith.constant 0 : i32
    %c0_i32_1 = arith.constant 0 : i32
    return %c0_i32, %c0_i32_0 : i32, i32
  }
  func.func @transform_2(%arg0: i32) -> (i32, i32) {
    %c0_i32 = arith.constant 0 : i32
    %c0_i32_0 = arith.constant 0 : i32
    return %arg0, %c0_i32 : i32, i32
  }
  func.func @transform_3(%arg0: i32) -> (i32, i32) {
    %c0_i32 = arith.constant 0 : i32
    %c0_i32_0 = arith.constant 0 : i32
    return %arg0, %c0_i32 : i32, i32
  }
}

</mosaic_0001>

<bundles_post_ra>
// kernel: tpu_custom_call.1
= control target key start
LH: loop header
LB: loop body
LE: loop exit
PB: predicated region body
PF: predicated region fallthrough
CT: control target
= control target key end

     0   :  { %9 = vsyncpa [#allocation3], 0  ;;  %vm44_vm0 = vcmask 261120   ;;  %s741_s0 = inlined_call_operand.vmem [shape: f32[16,32], index: 0, kind: input, shape index: {}]   ;;  %s742_s1 = inlined_call_operand.vmem [shape: f32[184,64], index: 1, kind: input, shape index: {}]   ;;  %s743_s2 = inlined_call_operand.hbm [shape: f32[16,32], index: 2, kind: output, shape index: {0}]   ;;  %s744_s3 = inlined_call_operand.hbm [shape: f32[8,128], index: 3, kind: output, shape index: {1}]  }
   0x1   :  { %v17_v0 = vld [vmem:[%s742_s1] sm:$0xff]  ;;  %v18_v1 = vld [vmem:[%s742_s1 + $0x8] sm:$0xff]  ;;  %v19_v2 = vld [vmem:[%s742_s1 + $0x10] sm:$0xff] }
   0x2   :  { %v500_v3 = vpack.c.bf16 %v18_v1, %v17_v0  ;;  %v20_v4 = vld [vmem:[%s742_s1 + $0x18] sm:$0xff]  ;;  %v15_v5 = vld [vmem:[%s741_s0] sm:$0xff] }
   0x3   :  { %v504_v6 = vpack.c.bf16 %v20_v4, %v19_v2  ;;  %459 = vmatprep.mubr.msk.f32.mxu0 %vm44_vm0, %v15_v5 }
   0x4   :  { %10 = vsyncpa [#allocation5], 0  ;;  %501 = vmatprep.subr.bf16.mxu0 %v500_v3  ;;  %v16_v7 = vld [vmem:[%s741_s0 + $0x8] sm:$0xff]  ;;  %v23_v9 = vld [vmem:[%s742_s1 + $0x30] sm:$0xff]  ;;  %vm132_vm1 = vcmask 523264   ;;  %s604_s6 = smov [#allocation2]  }
   0x5   :  { %503 = vmatpush3.bf16.msra.mxu0 %v500_v3  ;;  %v22_v8 = vld [vmem:[%s742_s1 + $0x28] sm:$0xff]  ;;  %v24_v11 = vld [vmem:[%s742_s1 + $0x38] sm:$0xff]  ;;  %v25_v12 = vld [vmem:[%s742_s1 + $0x40] sm:$0xff]  ;;  %s391_s7 = sshll.u32 %s604_s6, 4  ;;  %s392_s7 = int_to_ptr.vmem [resolvable:$true] %s391_s7 }
   0x6   :  { %505 = vmatprep.subr.bf16.mxu0 %v504_v6  ;;  %v508_v10 = vpack.c.bf16 %v23_v9, %v22_v8  ;;  %v512_v13 = vpack.c.bf16 %v25_v12, %v24_v11  ;;  %v26_v14 = vld [vmem:[%s742_s1 + $0x48] sm:$0xff]  ;;  %v27_v15 = vld [vmem:[%s742_s1 + $0x50] sm:$0xff]  ;;  %v28_v16 = vld [vmem:[%s742_s1 + $0x58] sm:$0xff]  ;;  %s555_s8 = scalar_lea.vmem %s392_s7, 256  ;;  %p560_p1 = scmp.lt.s32.totalorder %s392_s7, %s392_s7 }
   0x7   :  { %v516_v17 = vpack.c.bf16 %v27_v15, %v26_v14  ;;  %v29_v18 = vld [vmem:[%s742_s1 + $0x60] sm:$0xff]  ;;  %v31_v20 = vld [vmem:[%s742_s1 + $0x70] sm:$0xff]  ;;  %v32_v21 = vld [vmem:[%s742_s1 + $0x78] sm:$0xff]  ;;  %p556_p0 = scmp.ne.s32.totalorder %s392_s7, %s555_s8  ;;  %p561_p2 = scmp.lt.s32.totalorder %s555_s8, %s555_s8 }
   0x8   :  { %509 = vmatprep.subr.bf16.mxu1 %v508_v10  ;;  %v520_v19 = vpack.c.bf16 %v29_v18, %v28_v16  ;;  %v33_v22 = vld [vmem:[%s742_s1 + $0x80] sm:$0xff]  ;;  %v524_v23 = vpack.c.bf16 %v32_v21, %v31_v20  ;;  %v34_v24 = vld [vmem:[%s742_s1 + $0x88] sm:$0xff]  ;;  %v35_v26 = vld [vmem:[%s742_s1 + $0x90] sm:$0xff] }
   0x9   :  { %507 = vmatpush3.bf16.msra.mxu0 %v504_v6  ;;  %511 = vmatpush3.bf16.msra.mxu1 %v508_v10  ;;  %v528_v25 = vpack.c.bf16 %v34_v24, %v33_v22  ;;  %v36_v27 = vld [vmem:[%s742_s1 + $0x98] sm:$0xff]  ;;  %v416_v29 = vld [vmem:[%s742_s1 + $0x20] ss:$0 sm:$0xff]  ;;  %v38_v37 = vld [vmem:[%s742_s1 + $0xa8] sm:$0xff]  ;;  %p562_p3 = por %p561_p2, %p560_p1 }
   0xa   :  { %513 = vmatprep.subr.bf16.mxu1 %v512_v13  ;;  %525 = vmatprep.subr.bf16.mxu0 %v524_v23  ;;  %v532_v28 = vpack.c.bf16 %v36_v27, %v35_v26  ;;  %v37_v36 = vld [vmem:[%s742_s1 + $0xa0] sm:$0xff]  ;;  %v419_v39 = vld [vmem:[%s742_s1 + $0x68] ss:$0 sm:$0xff]  ;;  %v422_v44 = vld [vmem:[%s742_s1 + $0xb0] ss:$0 sm:$0xff]  ;;  %s603_s1 = smov 96  }
   0xb   :  { %v536_v38 = vpack.c.bf16 %v38_v37, %v37_v36  ;;  %p563_p4 = pnand %p562_p3, %p556_p0 }
   0xc   :  { %460 = vmatmul.mubr.msk.f32.vlgmr.msra.gmra.mrb[0].mxu0 %vm44_vm0, %v16_v7 }
   0xd   :  { %515 = vmatpush3.bf16.msra.mxu1 %v512_v13  ;;  %527 = vmatpush3.bf16.msra.mxu0 %v524_v23 }
   0xe   :  { %517 = vmatprep.subr.bf16.mxu1 %v516_v17  ;;  %529 = vmatprep.subr.bf16.mxu0 %v528_v25 }
  0x11   :  { %519 = vmatpush3.bf16.msra.mxu1 %v516_v17  ;;  %531 = vmatpush3.bf16.msra.mxu0 %v528_v25 }
  0x12   :  { %521 = vmatprep.subr.bf16.mxu1 %v520_v19  ;;  %533 = vmatprep.subr.bf16.mxu0 %v532_v28 }
  0x15   :  { %523 = vmatpush3.bf16.msra.mxu1 %v520_v19  ;;  %535 = vmatpush3.bf16.msra.mxu0 %v532_v28 }
  0x16   :  { %537 = vmatprep.subr.bf16.mxu0 %v536_v38 }
  0x19   :  { %539 = vmatpush3.bf16.msra.mxu0 %v536_v38 }
  0xdf   :  { %v461_v30 = vpop.f32.mrb[0].mxu0 }
  0xe0   :  { %v123_v31 = vadd.f32 %v461_v30, %v416_v29  ;;  %v117_v32 = vpop.f32.mrb[1].mxu0 }
  0xe1   :  { %v118_v33 = vadd.f32 %v416_v29, %v117_v32 }
  0xe3   :  { %551 = vtanh.f32 %v118_v33 }
  0xe4   :  { %553 = vtanh.f32 %v123_v31 }
  0xed   :  { %v552_v34 = vpop.eup %551 }
  0xee   :  { %v554_v35 = vpop.eup %553  ;;  %478 = vmatprep.mubr.msk.f32.mxu1 %vm132_vm1, %v552_v34 }
  0xef   :  { %479 = vmatmul.mubr.msk.f32.vlgmr.msra.gmra.mrb[0].mxu1 %vm132_vm1, %v554_v35 }
 0x1c2   :  { %v480_v40 = vpop.f32.mrb[0].mxu1 }
 0x1c3   :  { %v205_v41 = vpop.f32.mrb[1].mxu1  ;;  %v211_v43 = vadd.f32 %v480_v40, %v419_v39 }
 0x1c4   :  { %v206_v42 = vadd.f32 %v419_v39, %v205_v41 }
 0x1c6   :  { %497 = vmatprep.mubr.msk.f32.mxu0 %vm132_vm1, %v206_v42 }
 0x1c7   :  { %498 = vmatmul.mubr.msk.f32.vlgmr.msra.gmra.mrb[2].mxu0 %vm132_vm1, %v211_v43 }
 0x29a   :  { %v499_v45 = vpop.f32.mrb[2].mxu0 }
 0x29b   :  { %v296_v46 = vadd.f32 %v499_v45, %v422_v44  ;;  %v290_v47 = vpop.f32.mrb[3].mxu0 }
 0x29c   :  { %v291_v48 = vadd.f32 %v422_v44, %v290_v47 }
 0x29d   :  { %v300_v49 = vadd.f32 %v296_v46, %v211_v43  ;;  %v333_v50 = vmul.f32 %v296_v46, %v296_v46 }
 0x29e   :  { %v299_v51 = vadd.f32 %v291_v48, %v206_v42  ;;  %v332_v52 = vmul.f32 %v291_v48, %v291_v48 }
 0x29f   :  { %302 = vst.msk [vmem:[#allocation2 + $0x8] sm:$0xff] %vm44_vm0, %v300_v49  ;;  %v317_v53 = vmul.f32 %v300_v49, %v300_v49  ;;  %v337_v54 = vsel %vm44_vm0, %v333_v50, 0.0 }
 0x2a0   :  { %301 = vst.msk [vmem:[#allocation2] sm:$0xff] %vm44_vm0, %v299_v51  ;;  %v316_v55 = vmul.f32 %v299_v51, %v299_v51  ;;  %v336_v56 = vsel %vm44_vm0, %v332_v52, 0.0 }
 0x2a1   :  { %v321_v57 = vsel %vm44_vm0, %v317_v53, 0.0  ;;  %v338_v58 = vadd.f32 %v337_v54, %v336_v56 }
 0x2a2   :  { %350 = vrot.lane.b32.xlu0 %v316_v55, %s603_s1  ;;  %v320_v59 = vsel %vm44_vm0, %v316_v55, 0.0 }
 0x2a3   :  { %v322_v60 = vadd.f32 %v321_v57, %v320_v59 }
 0x2a5   :  { %323 = vadd.xlane.f32.xlu1 %v322_v60 }
 0x2a6   :  { %352 = vrot.lane.b32.xlu0 %v317_v53, %s603_s1 }
 0x2a9   :  { %339 = vadd.xlane.f32.xlu1 %v338_v58 }
 0x314   :  { %v351_v61 = vpop.permute.xlu0 %350 }
 0x315   :  { %v356_v63 = vsel %vm44_vm0, %v351_v61, 0.0 }
 0x318   :  { %v353_v62 = vpop.permute.xlu0 %352 }
 0x319   :  { %v357_v0 = vsel %vm44_vm0, %v353_v62, 0.0 }
 0x31a   :  { %v358_v1 = vadd.f32 %v357_v0, %v356_v63 }
 0x31c   :  { %359 = vadd.xlane.f32.xlu0 %v358_v1 }
 0x332   :  { %v324_v2 = vpop.xlane.xlu1 %323 }
 0x333   :  { %v325_v3 = vrot.slane %v324_v2, 4 }
 0x335   :  { %v326_v4 = vadd.f32 %v325_v3, %v324_v2 }
 0x336   :  { %v340_v5 = vpop.xlane.xlu1 %339 }
 0x337   :  { %v327_v6 = vrot.slane %v326_v4, 2  ;;  %v341_v7 = vrot.slane %v340_v5, 4 }
 0x339   :  { %v342_v8 = vadd.f32 %v341_v7, %v340_v5  ;;  %v328_v9 = vadd.f32 %v327_v6, %v326_v4 }
 0x33b   :  { %v343_v10 = vrot.slane %v342_v8, 2  ;;  %v329_v11 = vrot.slane %v328_v9, 1 }
 0x33d   :  { %v344_v12 = vadd.f32 %v343_v10, %v342_v8  ;;  %v330_v13 = vadd.f32 %v329_v11, %v328_v9 }
 0x33f   :  { %540 = vpush %v330_v13  ;;  %v345_v14 = vrot.slane %v344_v12, 1 }
 0x341   :  { %v346_v15 = vadd.f32 %v345_v14, %v344_v12 }
 0x343   :  { %542 = vpush %v346_v15 }
 0x344   :  { %566 = shalt.err (!%p563_p4)
}
 0x345   :  { %s567_s11 = scalar_lea.hbm %s743_s2, 256 }
 0x346   :  { %p568_p5 = scmp.ne.s32.totalorder %s743_s2, %s567_s11  ;;  %p571_p6 = scmp.lt.u32.totalorder %s567_s11, %s743_s2 }
 0x348   :  { %p573_p7 = pnand %p571_p6, %p568_p5 }
 0x34a   :  { %576 = shalt.err (!%p573_p7)
}
 0x34b   :  { %s605_s16 = smov 128   ;;  %s606_s17 = smov 8   ;;  %v303_v23 = vlaneseq }
 0x34c   :  { %397 = dma.vmem_to_hbm [thread:$0]  %s392_s7, 256, %s743_s2, [#allocation3], %s605_s16, %s605_s16, %s606_s17  }
 0x34d   :  { %v304_v24 = vshrl.u32 %v303_v23, 7  ;;  %v369_v25 = vand.u32 127, %v303_v23  ;;  %s607_s22 = smov [#allocation4]  }
 0x34e   :  { %s404_s23 = sshll.u32 %s607_s22, 4  ;;  %s405_s23 = int_to_ptr.vmem [resolvable:$true] %s404_s23 }
 0x34f   :  { %vm375_vm2 = vcmp.eq.s32.totalorder %v369_v25, 1  ;;  %vm370_vm3 = vcmp.eq.s32.totalorder %v304_v24, 0  ;;  %vm371_vm4 = vcmp.eq.s32.totalorder %v369_v25, 0  ;;  %vm380_vm6 = vcmp.eq.s32.totalorder %v369_v25, 2  ;;  %s577_s24 = scalar_lea.vmem %s405_s23, 128  ;;  %p582_p9 = scmp.lt.s32.totalorder %s405_s23, %s405_s23 }
 0x350   :  { %vm376_vm5 = vmand %vm370_vm3, %vm375_vm2  ;;  %p578_p8 = scmp.ne.s32.totalorder %s405_s23, %s577_s24  ;;  %p583_p10 = scmp.lt.s32.totalorder %s577_s24, %s577_s24 }
 0x351   :  { %vm372_vm7 = vmand %vm370_vm3, %vm371_vm4 }
 0x352   :  { %vm381_vm8 = vmand %vm370_vm3, %vm380_vm6  ;;  %p584_p11 = por %p583_p10, %p582_p9 }
 0x354   :  { %p585_p12 = pnand %p584_p11, %p578_p8 }
 0x370   :  { %s541_s20 = spop %540 }
 0x371   :  { %v373_v27 = vstv %s541_s20 }
 0x372   :  { %v374_v29 = vsel %vm372_vm7, %v373_v27, 0.0 }
 0x374   :  { %s543_s21 = spop %542 }
 0x375   :  { %v377_v26 = vstv %s543_s21 }
 0x376   :  { %v378_v28 = vsel %vm376_vm5, %v377_v26, 0.0 }
 0x377   :  { %v379_v30 = vadd.f32 %v378_v28, %v374_v29 }
 0x3a9   :  { %v360_v16 = vpop.xlane.xlu0 %359 }
 0x3aa   :  { %v361_v17 = vrot.slane %v360_v16, 4 }
 0x3ac   :  { %v362_v18 = vadd.f32 %v361_v17, %v360_v16 }
 0x3ae   :  { %v363_v19 = vrot.slane %v362_v18, 2 }
 0x3b0   :  { %v364_v20 = vadd.f32 %v363_v19, %v362_v18 }
 0x3b2   :  { %v365_v21 = vrot.slane %v364_v20, 1 }
 0x3b4   :  { %v366_v22 = vadd.f32 %v365_v21, %v364_v20 }
 0x3b6   :  { %544 = vpush %v366_v22 }
 0x3e7   :  { %s545_s2 = spop %544 }
 0x3e8   :  { %v382_v31 = vstv %s545_s2 }
 0x3e9   :  { %v383_v32 = vsel %vm381_vm8, %v382_v31, 0.0 }
 0x3ea   :  { %v384_v33 = vadd.f32 %v383_v32, %v379_v30 }
 0x3ec   :  { %385 = vst [vmem:[#allocation4] sm:$0xff] %v384_v33 }
 0x3ed   :  { %588 = shalt.err (!%p585_p12)
}
 0x3ee   :  { %s589_s27 = scalar_lea.hbm %s744_s3, 128 }
 0x3ef   :  { %p590_p13 = scmp.ne.s32.totalorder %s744_s3, %s589_s27  ;;  %p593_p0 = scmp.lt.u32.totalorder %s589_s27, %s744_s3 }
 0x3f1   :  { %p595_p1 = pnand %p593_p0, %p590_p13 }
 0x3f3   :  { %598 = shalt.err (!%p595_p1)
}
 0x3f4   :  { %407 = dma.vmem_to_hbm [thread:$0]  %s405_s23, 128, %s744_s3, [#allocation5]  }
 0x3f5   :  { %599 = dma.done.wait [#allocation3], 256  }
 0x3f6   :  { %600 = vsyncadd [#allocation3], 4294967040 }
 0x3f7   :  { %601 = dma.done.wait [#allocation5], 128  }
 0x3f8   :  { %602 = vsyncadd [#allocation5], 4294967168 }
 0x3f9   :  { %414 = vsyncpa [#allocation3], 1 }
 0x3fa   :  { %415 = vsyncpa [#allocation5], 1 }

</bundles_post_ra>
